<compile_context>
chip_gen: v7x
topology: tpu7x:2x2x1
jax: 0.10.0
libtpu: 0.0.40
codegen_flags: <defaults>
</compile_context>

<pallas_src>
import jax
import jax.numpy as jnp
from jax.experimental import pallas as pl
from jax.experimental.pallas import tpu as pltpu


def _round_up(n, m):
    return ((n + m - 1) // m) * m


def _singlenet_kernel(x_ref, w1x_ref, b10_ref, b11_ref, w2_ref, b2_ref,
                      w3c0_ref, w3c1_ref, b3_ref, out_ref):
    x = x_ref[...]                                             # (T, Dx)  f32
    tb = x.shape[0]

    # Layer 1 term shared by both treatment branches: x @ W1[:dx].
    pre = jnp.dot(x, w1x_ref[...], preferred_element_type=jnp.float32)  # (T, H)

    # Per-branch folded biases; stack branches along sublanes so layer 2
    # runs as a single matmul pass over both branches.
    h = jnp.maximum(
        jnp.concatenate([pre + b10_ref[...], pre + b11_ref[...]], axis=0),
        0.0)                                                   # (2T, H)

    # Layer 2 (fused for both branches).
    z = jnp.maximum(
        jnp.dot(h, w2_ref[...], preferred_element_type=jnp.float32)
        + b2_ref[...],
        0.0)                                                   # (2T, H)

    # Layer 3: column-padded W3 weights route branch 0 -> column 0 and
    # branch 1 -> column 1 directly inside the matmul, giving one unmasked
    # contiguous (T, 2) result (no lane shuffles / per-column stores).
    y = (jnp.dot(z[:tb], w3c0_ref[...], preferred_element_type=jnp.float32)
         + jnp.dot(z[tb:], w3c1_ref[...], preferred_element_type=jnp.float32)
         + b3_ref[...])                                        # (T, 2)
    out_ref[...] = y.astype(out_ref.dtype)


def _prepare_params(params, dim_x):
    """Wrapper-side repacking so the kernel never slices weights."""
    w1, b1 = params["w1"], params["b1"]
    w2, b2 = params["w2"], params["b2"]
    w3, b3 = params["w3"], params["b3"]

    w1x = w1[:dim_x, :]                        # (Dx, H)
    w1t = w1[dim_x:dim_x + 1, :]               # (1, H)  treatment row
    b1_0 = b1                                  # t = 0 branch bias
    b1_1 = b1 + w1t                            # t = 1 branch bias (t folded in)

    zeros_col = jnp.zeros_like(w3)
    w3_c0 = jnp.concatenate([w3, zeros_col], axis=1)   # (H, 2): col 0 -> y0
    w3_c1 = jnp.concatenate([zeros_col, w3], axis=1)   # (H, 2): col 1 -> y1
    b3_row = jnp.concatenate([b3, b3], axis=1)         # (1, 2)

    return (w1x, b1_0, b1_1, w2, b2, w3_c0, w3_c1, b3_row)


def _reference_forward(x, params):
    """Pure-JAX reference matching the PyTorch semantics (explicit concat)."""
    B = x.shape[0]

    def y_nn(inp):
        h = jnp.maximum(inp @ params["w1"] + params["b1"], 0.0)
        z = jnp.maximum(h @ params["w2"] + params["b2"], 0.0)
        return z @ params["w3"] + params["b3"]

    x0 = jnp.concatenate([x, jnp.zeros((B, 1), x.dtype)], axis=1)
    x1 = jnp.concatenate([x, jnp.ones((B, 1), x.dtype)], axis=1)
    return jnp.concatenate([y_nn(x0), y_nn(x1)], axis=1)


def singlenet_forward(x, params, *, tile_b=4096, min_kernel_batch=2048):
    """SingleNet forward: x (B, dim_x) f32 -> (B, 2) f32 = [y0 | y1].

    For batches below `min_kernel_batch` the pure-JAX path is used (pallas_call
    fixed overhead dominates at tiny sizes); pass min_kernel_batch=0 to force
    the Pallas kernel.
    """
    B, dim_x = x.shape
    if B < min_kernel_batch:
        return _reference_forward(x, params)

    prepared = _prepare_params(params, dim_x)
    hidden = prepared[0].shape[1]

    # Batch tile: multiple of 8 sublanes, no larger than the (padded) batch.
    tb = min(_round_up(tile_b, 8), _round_up(B, 8))
    b_pad = _round_up(B, tb)
    x_p = jnp.pad(x, ((0, b_pad - B), (0, 0))) if b_pad != B else x
    grid = (pl.cdiv(b_pad, tb),)

    x_spec = pl.BlockSpec((tb, dim_x), lambda i: (i, 0))
    # Weights / biases: constant index_map -> fetched once, VMEM-resident.
    w_specs = [pl.BlockSpec(p.shape, lambda i: (0, 0)) for p in prepared]
    out_spec = pl.BlockSpec((tb, 2), lambda i: (i, 0))

    param_bytes = sum(int(p.size) * p.dtype.itemsize for p in prepared)
    flops = b_pad * (2 * dim_x * hidden + 4 * hidden * hidden + 8 * hidden)
    bytes_accessed = b_pad * (dim_x + 2) * 4 + param_bytes

    out = pl.pallas_call(
        _singlenet_kernel,
        out_shape=jax.ShapeDtypeStruct((b_pad, 2), jnp.float32),
        grid=grid,
        in_specs=[x_spec] + w_specs,
        out_specs=out_spec,
        compiler_params=pltpu.CompilerParams(
            dimension_semantics=("parallel",),
            vmem_limit_bytes=32 * 1024 * 1024),
        cost_estimate=pl.CostEstimate(
            flops=flops, transcendentals=0, bytes_accessed=bytes_accessed),
    )(x_p, *prepared)

    return out[:B] if b_pad != B else out


def init_params(key, dim_x, hidden):
    """Deterministic synthetic parameters for the y_nn MLP."""
    k1, k2, k3 = jax.random.split(key, 3)
    scale = 0.1
    return {
        "w1": scale * jax.random.normal(k1, (dim_x + 1, hidden), jnp.float32),
        "b1": jnp.zeros((1, hidden), jnp.float32),
        "w2": scale * jax.random.normal(k2, (hidden, hidden), jnp.float32),
        "b2": jnp.zeros((1, hidden), jnp.float32),
        "w3": scale * jax.random.normal(k3, (hidden, 1), jnp.float32),
        "b3": jnp.zeros((1, 1), jnp.float32),
    }


if __name__ == "__main__":
    B, DIM_X, HIDDEN = 50, 4, 32
    TILE_B = 16   # small tile -> exercises multi-step grid + ragged padding

    key = jax.random.PRNGKey(0)
    kx, kp = jax.random.split(key)
    x = jax.random.normal(kx, (B, DIM_X), jnp.float32)
    params = init_params(kp, DIM_X, HIDDEN)

    out = singlenet_forward(x, params, tile_b=TILE_B, min_kernel_batch=0)
    out = jax.block_until_ready(out)

    ref = _reference_forward(x, params)
    assert out.shape == (B, 2), out.shape
    assert jnp.allclose(out, ref, atol=1e-5, rtol=1e-5), "mismatch vs reference"

    print("KERNEL_OK")
</pallas_src>

<mosaic_0001>
module attributes {stable_mosaic.version = 11 : i64} {
  func.func @_singlenet_kernel(%arg0: i32, %arg1: memref<16x4xf32, #tpu.memory_space<vmem>>, %arg2: memref<4x32xf32, #tpu.memory_space<vmem>>, %arg3: memref<1x32xf32, #tpu.memory_space<vmem>>, %arg4: memref<1x32xf32, #tpu.memory_space<vmem>>, %arg5: memref<32x32xf32, #tpu.memory_space<vmem>>, %arg6: memref<1x32xf32, #tpu.memory_space<vmem>>, %arg7: memref<32x2xf32, #tpu.memory_space<vmem>>, %arg8: memref<32x2xf32, #tpu.memory_space<vmem>>, %arg9: memref<1x2xf32, #tpu.memory_space<vmem>>, %arg10: memref<16x2xf32, #tpu.memory_space<vmem>>) attributes {dimension_semantics = [#tpu.dimension_semantics<parallel>], iteration_bounds = array<i64: 4>, scalar_prefetch = 0 : i64, scratch_operands = 0 : i64, tpu.core_type = #tpu.core_type<tc>, window_params = [{transform_indices = @transform_0, window_bounds = array<i64: 16, 4>}, {pipeline_mode = #tpu.pipeline_mode<synchronous>, transform_indices = @transform_1, window_bounds = array<i64: 4, 32>}, {pipeline_mode = #tpu.pipeline_mode<synchronous>, transform_indices = @transform_2, window_bounds = array<i64: 1, 32>}, {pipeline_mode = #tpu.pipeline_mode<synchronous>, transform_indices = @transform_3, window_bounds = array<i64: 1, 32>}, {pipeline_mode = #tpu.pipeline_mode<synchronous>, transform_indices = @transform_4, window_bounds = array<i64: 32, 32>}, {pipeline_mode = #tpu.pipeline_mode<synchronous>, transform_indices = @transform_5, window_bounds = array<i64: 1, 32>}, {pipeline_mode = #tpu.pipeline_mode<synchronous>, transform_indices = @transform_6, window_bounds = array<i64: 32, 2>}, {pipeline_mode = #tpu.pipeline_mode<synchronous>, transform_indices = @transform_7, window_bounds = array<i64: 32, 2>}, {pipeline_mode = #tpu.pipeline_mode<synchronous>, transform_indices = @transform_8, window_bounds = array<i64: 1, 2>}, {transform_indices = @transform_9, window_bounds = array<i64: 16, 2>}]} {
    %c0 = arith.constant 0 : index
    %c0_0 = arith.constant 0 : index
    %0 = vector.load %arg1[%c0, %c0_0] : memref<16x4xf32, #tpu.memory_space<vmem>>, vector<16x4xf32>
    %c0_1 = arith.constant 0 : index
    %c0_2 = arith.constant 0 : index
    %1 = vector.load %arg2[%c0_1, %c0_2] : memref<4x32xf32, #tpu.memory_space<vmem>>, vector<4x32xf32>
    %cst = arith.constant dense<0.000000e+00> : vector<16x32xf32>
    %2 = tpu.matmul %0, %1, %cst {dimension_numbers = #tpu.dot_dimension_numbers<[1], [0], [0], [1], [0, 0, 1, 1], [], []>} : vector<16x4xf32>, vector<4x32xf32>, vector<16x32xf32> -> vector<16x32xf32>
    %c0_3 = arith.constant 0 : index
    %c0_4 = arith.constant 0 : index
    %3 = vector.load %arg3[%c0_3, %c0_4] : memref<1x32xf32, #tpu.memory_space<vmem>>, vector<1x32xf32>
    %4 = vector.broadcast %3 : vector<1x32xf32> to vector<16x32xf32>
    %5 = arith.addf %2, %4 : vector<16x32xf32>
    %c0_5 = arith.constant 0 : index
    %c0_6 = arith.constant 0 : index
    %6 = vector.load %arg4[%c0_5, %c0_6] : memref<1x32xf32, #tpu.memory_space<vmem>>, vector<1x32xf32>
    %7 = vector.broadcast %6 : vector<1x32xf32> to vector<16x32xf32>
    %8 = arith.addf %2, %7 : vector<16x32xf32>
    %9 = tpu.concatenate %5, %8 in 0 : vector<16x32xf32>, vector<16x32xf32> -> vector<32x32xf32>
    %cst_7 = arith.constant 0.000000e+00 : f32
    %10 = vector.broadcast %cst_7 : f32 to vector<32x32xf32>
    %11 = arith.maximumf %9, %10 : vector<32x32xf32>
    %c0_8 = arith.constant 0 : index
    %c0_9 = arith.constant 0 : index
    %12 = vector.load %arg5[%c0_8, %c0_9] : memref<32x32xf32, #tpu.memory_space<vmem>>, vector<32x32xf32>
    %cst_10 = arith.constant dense<0.000000e+00> : vector<32x32xf32>
    %13 = tpu.matmul %11, %12, %cst_10 {dimension_numbers = #tpu.dot_dimension_numbers<[1], [0], [0], [1], [0, 0, 1, 1], [], []>} : vector<32x32xf32>, vector<32x32xf32>, vector<32x32xf32> -> vector<32x32xf32>
    %c0_11 = arith.constant 0 : index
    %c0_12 = arith.constant 0 : index
    %14 = vector.load %arg6[%c0_11, %c0_12] : memref<1x32xf32, #tpu.memory_space<vmem>>, vector<1x32xf32>
    %15 = vector.broadcast %14 : vector<1x32xf32> to vector<32x32xf32>
    %16 = arith.addf %13, %15 : vector<32x32xf32>
    %cst_13 = arith.constant 0.000000e+00 : f32
    %17 = vector.broadcast %cst_13 : f32 to vector<32x32xf32>
    %18 = arith.maximumf %16, %17 : vector<32x32xf32>
    %19 = vector.extract_strided_slice %18 {offsets = [0, 0], sizes = [16, 32], strides = [1, 1]} : vector<32x32xf32> to vector<16x32xf32>
    %c0_14 = arith.constant 0 : index
    %c0_15 = arith.constant 0 : index
    %20 = vector.load %arg7[%c0_14, %c0_15] : memref<32x2xf32, #tpu.memory_space<vmem>>, vector<32x2xf32>
    %cst_16 = arith.constant dense<0.000000e+00> : vector<16x2xf32>
    %21 = tpu.matmul %19, %20, %cst_16 {dimension_numbers = #tpu.dot_dimension_numbers<[1], [0], [0], [1], [0, 0, 1, 1], [], []>} : vector<16x32xf32>, vector<32x2xf32>, vector<16x2xf32> -> vector<16x2xf32>
    %22 = vector.extract_strided_slice %18 {offsets = [16, 0], sizes = [16, 32], strides = [1, 1]} : vector<32x32xf32> to vector<16x32xf32>
    %c0_17 = arith.constant 0 : index
    %c0_18 = arith.constant 0 : index
    %23 = vector.load %arg8[%c0_17, %c0_18] : memref<32x2xf32, #tpu.memory_space<vmem>>, vector<32x2xf32>
    %cst_19 = arith.constant dense<0.000000e+00> : vector<16x2xf32>
    %24 = tpu.matmul %22, %23, %cst_19 {dimension_numbers = #tpu.dot_dimension_numbers<[1], [0], [0], [1], [0, 0, 1, 1], [], []>} : vector<16x32xf32>, vector<32x2xf32>, vector<16x2xf32> -> vector<16x2xf32>
    %25 = arith.addf %21, %24 : vector<16x2xf32>
    %c0_20 = arith.constant 0 : index
    %c0_21 = arith.constant 0 : index
    %26 = vector.load %arg9[%c0_20, %c0_21] : memref<1x2xf32, #tpu.memory_space<vmem>>, vector<1x2xf32>
    %27 = vector.broadcast %26 : vector<1x2xf32> to vector<16x2xf32>
    %28 = arith.addf %25, %27 : vector<16x2xf32>
    %c0_22 = arith.constant 0 : index
    %c0_23 = arith.constant 0 : index
    %29 = vector.load %arg10[%c0_22, %c0_23] : memref<16x2xf32, #tpu.memory_space<vmem>>, vector<16x2xf32>
    tpu.vector_store %arg10[%c0_22, %c0_23], %28 {strides = array<i32>} : memref<16x2xf32, #tpu.memory_space<vmem>>, vector<16x2xf32>,
    return
  }
  func.func @transform_0(%arg0: i32) -> (i32, i32) {
    %c0_i32 = arith.constant 0 : i32
    %c0_i32_0 = arith.constant 0 : i32
    return %arg0, %c0_i32 : i32, i32
  }
  func.func @transform_1(%arg0: i32) -> (i32, i32) {
    %c0_i32 = arith.constant 0 : i32
    %c0_i32_0 = arith.constant 0 : i32
    %c0_i32_1 = arith.constant 0 : i32
    return %c0_i32, %c0_i32_0 : i32, i32
  }
  func.func @transform_2(%arg0: i32) -> (i32, i32) {
    %c0_i32 = arith.constant 0 : i32
    %c0_i32_0 = arith.constant 0 : i32
    %c0_i32_1 = arith.constant 0 : i32
    return %c0_i32, %c0_i32_0 : i32, i32
  }
  func.func @transform_3(%arg0: i32) -> (i32, i32) {
    %c0_i32 = arith.constant 0 : i32
    %c0_i32_0 = arith.constant 0 : i32
    %c0_i32_1 = arith.constant 0 : i32
    return %c0_i32, %c0_i32_0 : i32, i32
  }
  func.func @transform_4(%arg0: i32) -> (i32, i32) {
    %c0_i32 = arith.constant 0 : i32
    %c0_i32_0 = arith.constant 0 : i32
    %c0_i32_1 = arith.constant 0 : i32
    return %c0_i32, %c0_i32_0 : i32, i32
  }
  func.func @transform_5(%arg0: i32) -> (i32, i32) {
    %c0_i32 = arith.constant 0 : i32
    %c0_i32_0 = arith.constant 0 : i32
    %c0_i32_1 = arith.constant 0 : i32
    return %c0_i32, %c0_i32_0 : i32, i32
  }
  func.func @transform_6(%arg0: i32) -> (i32, i32) {
    %c0_i32 = arith.constant 0 : i32
    %c0_i32_0 = arith.constant 0 : i32
    %c0_i32_1 = arith.constant 0 : i32
    return %c0_i32, %c0_i32_0 : i32, i32
  }
  func.func @transform_7(%arg0: i32) -> (i32, i32) {
    %c0_i32 = arith.constant 0 : i32
    %c0_i32_0 = arith.constant 0 : i32
    %c0_i32_1 = arith.constant 0 : i32
    return %c0_i32, %c0_i32_0 : i32, i32
  }
  func.func @transform_8(%arg0: i32) -> (i32, i32) {
    %c0_i32 = arith.constant 0 : i32
    %c0_i32_0 = arith.constant 0 : i32
    %c0_i32_1 = arith.constant 0 : i32
    return %c0_i32, %c0_i32_0 : i32, i32
  }
  func.func @transform_9(%arg0: i32) -> (i32, i32) {
    %c0_i32 = arith.constant 0 : i32
    %c0_i32_0 = arith.constant 0 : i32
    return %arg0, %c0_i32 : i32, i32
  }
}

</mosaic_0001>

<bundles_post_ra>
// kernel: tpu_custom_call.1
= control target key start
LH: loop header
LB: loop body
LE: loop exit
PB: predicated region body
PF: predicated region fallthrough
CT: control target
= control target key end

     0   :  { %s980_s30 = smov 0   ;;  %s1063_s0 = inlined_call_operand.vmem [shape: f32[64,4], index: 0, kind: input, shape index: {}]   ;;  %s1064_s1 = inlined_call_operand.vmem [shape: f32[4,32], index: 1, kind: input, shape index: {}]   ;;  %s1065_s2 = inlined_call_operand.vmem [shape: f32[1,32], index: 2, kind: input, shape index: {}]   ;;  %s1066_s3 = inlined_call_operand.vmem [shape: f32[1,32], index: 3, kind: input, shape index: {}]   ;;  %s1067_s4 = inlined_call_operand.vmem [shape: f32[32,32], index: 4, kind: input, shape index: {}]   ;;  %s1068_s5 = inlined_call_operand.vmem [shape: f32[1,32], index: 5, kind: input, shape index: {}]   ;;  %s1069_s6 = inlined_call_operand.vmem [shape: f32[32,2], index: 6, kind: input, shape index: {}]   ;;  %s1070_s7 = inlined_call_operand.vmem [shape: f32[32,2], index: 7, kind: input, shape index: {}]   ;;  %s1071_s8 = inlined_call_operand.vmem [shape: f32[1,2], index: 8, kind: input, shape index: {}]   ;;  %s1072_s9 = inlined_call_operand.vmem [shape: f32[64,2], index: 9, kind: output, shape index: {}]  }
   0x1 LB: > { %s798_s10 = sadd.s32 4294967295, %s928_s30   ;;  %p802_p0 = scmp.ge.s32.totalorder %s928_s30, 1  ;;  %s928_s30 = sphi %s980_s30, %s19_s30  }
   0x2   : > { %p288_p1 = scmp.lt.s32.totalorder %s928_s30, 5 }
   0x4   : > { %p289_p2 = pnand %p802_p0, %p288_p1 }
   0x5   : > { %v338_v0 = vld [vmem:[%s1064_s1] sm:$0xf] (!%p289_p2)  ;;  %vm346_vm0 = vcmask (!%p289_p2), 1043456   ;;  %s803_s13 = sshll.u32 (!%p289_p2), %s798_s10, 1  ;;  %v448_v2 = vld [vmem:[%s1067_s4 + $0x8] sm:$0xff] (!%p289_p2)  ;;  %vm339_vm1 = vcmask (!%p289_p2), 31744  }
   0x6   : > { %292 = sbr.rel (%p289_p2) target bundleno = 682 (0x2aa), region = 56  ;;  %v447_v1 = vld [vmem:[%s1067_s4] sm:$0xff] (!%p289_p2)  ;;  %847 = vmatprep.subr.msk.mxu1 (!%p289_p2), %vm346_vm0, %v338_v0  ;;  %p325_p3 = scmp.lt.s32.totalorder (!%p289_p2), %s803_s13, 7  ;;  %v449_v6 = vld [vmem:[%s1067_s4 + $0x10] sm:$0xff] (!%p289_p2)  ;;  %v450_v7 = vld [vmem:[%s1067_s4 + $0x18] sm:$0xff] (!%p289_p2)  ;;  %vm458_vm2 = vcmask (!%p289_p2), 261120  }
   0x7   : > { %848 = vmatpush3.msk.msra.mxu1 (!%p289_p2), %vm346_vm0, %v338_v0  ;;  %v888_v3 = vpack.c.bf16 (!%p289_p2), %v448_v2, %v447_v1  ;;  %v892_v8 = vpack.c.bf16 (!%p289_p2), %v450_v7, %v449_v6  ;;  %v810_v9 = vld [vmem:[%s1065_s2] ss:$0 sm:$0xff] (!%p289_p2)  ;;  %v565_v22 = vld [vmem:[%s1070_s7 + $0x8] sm:$0xff] (!%p289_p2)  ;;  %v566_v24 = vld [vmem:[%s1070_s7 + $0x10] sm:$0xff] (!%p289_p2)  ;;  %vm739_vm3 = vcmask (!%p289_p2), 15360  }
   0x8   : > { %v811_v10 = vld [vmem:[%s1066_s3] ss:$0 sm:$0xff] (!%p289_p2)  ;;  %v567_v25 = vld [vmem:[%s1070_s7 + $0x18] sm:$0xff] (!%p289_p2)  ;;  %v561_v28 = vld [vmem:[%s1069_s6 + $0x8] sm:$0xff] (!%p289_p2) }
   0x9   : > { %889 = vmatprep.subr.bf16.mxu1 (!%p289_p2), %v888_v3  ;;  %v564_v21 = vld [vmem:[%s1070_s7] sm:$0xff] (!%p289_p2)  ;;  %v900_v26 = vpack.c.bf16 (!%p289_p2), %v567_v25, %v566_v24  ;;  %v562_v38 = vld [vmem:[%s1069_s6 + $0x10] sm:$0xff] (!%p289_p2)  ;;  %v563_v39 = vld [vmem:[%s1069_s6 + $0x18] sm:$0xff] (!%p289_p2) }
   0xa   : > { %v896_v23 = vpack.c.bf16 (!%p289_p2), %v565_v22, %v564_v21  ;;  %v560_v27 = vld [vmem:[%s1069_s6] sm:$0xff] (!%p289_p2)  ;;  %v908_v42 = vpack.c.bf16 (!%p289_p2), %v563_v39, %v562_v38 }
   0xb   : > { %v904_v29 = vpack.c.bf16 (!%p289_p2), %v561_v28, %v560_v27  ;;  %v812_v32 = vld [vmem:[%s1068_s5] ss:$0 sm:$0xff] (!%p289_p2) }
   0xc   : > { %897 = vmatprep.subr.bf16.mxu0 (!%p289_p2), %v896_v23  ;;  %v821_v46 = vld [vmem:[%s1071_s8] ss:$0 sm:$0xff] (!%p289_p2) }
   0xd   : > { %s1074_s13 = smov (!%p325_p3, %s803_s13), 7  ;;  %899 = vmatpush3.bf16.msra.mxu0 %v896_v23 }
   0xe   : > { %s804_s18 = sshll.u32 %s1074_s13, 3  ;;  %901 = vmatprep.subr.bf16.mxu0 %v900_v26 }
   0xf   : > { %s328_s21 = scalar_lea.vmem %s1063_s0, %s804_s18  ;;  %s334_s15 = scalar_lea.vmem %s1072_s9, %s804_s18 }
  0x10   : > { %v336_v4 = vld [vmem:[%s328_s21] sm:$0xff]  ;;  %v337_v5 = vld [vmem:[%s328_s21 + $0x8] sm:$0xff] }
  0x11   : > { %849 = vmatprep.mubr.msk.f32.mxu1 %vm339_vm1, %v336_v4  ;;  %903 = vmatpush3.bf16.msra.mxu0 %v900_v26 }
  0x12   : > { %850 = vmatmul.mubr.msk.f32.vlgmr.msra.gmra.mrb[0].mxu1 %vm339_vm1, %v337_v5  ;;  %905 = vmatprep.subr.bf16.mxu0 %v904_v29 }
  0x13   : > { %891 = vmatpush3.bf16.msra.mxu1 %v888_v3 }
  0x14   : > { %893 = vmatprep.subr.bf16.mxu1 %v892_v8 }
  0x17   : > { %895 = vmatpush3.bf16.msra.mxu1 %v892_v8 }
  0xe5   : > { %v851_v11 = vpop.f32.mrb[0].mxu1 }
  0xe6   : > { %v433_v12 = vadd.f32 %v851_v11, %v810_v9  ;;  %v416_v13 = vpop.f32.mrb[1].mxu1  ;;  %v442_v17 = vadd.f32 %v851_v11, %v811_v10 }
  0xe7   : > { %v432_v14 = vadd.f32 %v810_v9, %v416_v13  ;;  %v441_v15 = vadd.f32 %v811_v10, %v416_v13 }
  0xe8   : > { %v444_v18 = vmax.f32 %v433_v12, 0.0  ;;  %v446_v20 = vmax.f32 %v442_v17, 0.0 }
  0xe9   : > { %v443_v16 = vmax.f32 %v432_v14, 0.0  ;;  %v445_v19 = vmax.f32 %v441_v15, 0.0 }
  0xeb   : > { %860 = vmatprep.mubr.msk.f32.mxu1 %vm458_vm2, %v443_v16 }
  0xec   : > { %861 = vmatmul.mubr.msk.f32.vlgmr.msra.gmra.mrb[2].mxu1 %vm458_vm2, %v444_v18 }
  0xed   : > { %863 = vmatprep.mubr.msk.f32.mxu1 %vm458_vm2, %v445_v19 }
  0xf0   : > { %864 = vmatmul.mubr.msk.f32.gmra.mrb[4].mxu1 %vm458_vm2, %v446_v20 }
 0x1bf   : > { %v862_v30 = vpop.f32.mrb[2].mxu1 }
 0x1c0   : > { %v537_v31 = vpop.f32.mrb[3].mxu1  ;;  %v543_v44 = vadd.f32 %v862_v30, %v812_v32 }
 0x1c1   : > { %v538_v36 = vadd.f32 %v812_v32, %v537_v31 }
 0x1c2   : > { %v557_v45 = vmax.f32 %v543_v44, 0.0 }
 0x1c3   : > { %v865_v33 = vpop.f32.mrb[4].mxu1  ;;  %v556_v43 = vmax.f32 %v538_v36, 0.0 }
 0x1c4   : > { %v553_v34 = vadd.f32 %v865_v33, %v812_v32  ;;  %v547_v35 = vpop.f32.mrb[5].mxu1 }
 0x1c5   : > { %v548_v37 = vadd.f32 %v812_v32, %v547_v35 }
 0x1c6   : > { %v559_v41 = vmax.f32 %v553_v34, 0.0 }
 0x1c7   : > { %v558_v40 = vmax.f32 %v548_v37, 0.0 }
 0x1c9   : > { %874 = vmatprep.mubr.msk.f32.mxu0 %vm458_vm2, %v558_v40 }
 0x1ca   : > { %875 = vmatmul.mubr.msk.f32.vlgmr.msra.gmra.mrb[0].mxu0 %vm458_vm2, %v559_v41 }
 0x1cb   : > { %907 = vmatpush3.bf16.msra.mxu0 %v904_v29  ;;  %885 = vmatprep.mubr.msk.f32.mxu0 %vm458_vm2, %v556_v43 }
 0x1cc   : > { %909 = vmatprep.subr.bf16.mxu0 %v908_v42 }
 0x1cf   : > { %911 = vmatpush3.bf16.msra.mxu0 %v908_v42 }
 0x1d2   : > { %886 = vmatmul.mubr.msk.f32.vlgmr.msra.gmra.mrb[0].mxu0 %vm458_vm2, %v557_v45 }
 0x2a5   : > { %v887_v47 = vpop.f32.mrb[0].mxu0 }
 0x2a6   : > { %v721_v48 = vpop.f32.mrb[1].mxu0  ;;  %v738_v50 = vadd.f32 %v887_v47, %v821_v46 }
 0x2a7   : > { %v737_v49 = vadd.f32 %v821_v46, %v721_v48 }
 0x2a8   : > { %741 = vst.msk [vmem:[%s334_s15 + $0x8] sm:$0xff] %vm739_vm3, %v738_v50 }
 0x2a9   : > { %740 = vst.msk [vmem:[%s334_s15] sm:$0xff] %vm739_vm3, %v737_v49 }
 0x2aa PF: > { %s19_s30 = sadd.s32 1, %s928_s30  }
 0x2ab   : > { %p16_p4 = scmp.ge.s32.totalorder %s19_s30, 6  }
 0x2ad   :  { %18 = sbr.rel (!%p16_p4) target bundleno = 1 (0x1), region = 86 }

</bundles_post_ra>
